<compile_context>
chip_gen: v7x
topology: tpu7x:2x2x1
jax: 0.10.0
libtpu: 0.0.40
codegen_flags: <defaults>
</compile_context>

<pallas_src>
import jax
import jax.numpy as jnp
from jax.experimental import pallas as pl
from jax.experimental.pallas import tpu as pltpu

_MIB = 1024 * 1024


# ----------------------------- transforms ---------------------------------
# Affine transforms expose fold(scale, bias) -> (scale', bias') on per-channel
# (C,) accumulators so Compose can fuse consecutive affines into one mul+add.

class Normalize:
    """(x - mean) / std, per channel (mean/std shape (C,))."""

    def __init__(self, mean, std):
        self.mean = jnp.asarray(mean, jnp.float32).reshape(-1)
        self.std = jnp.asarray(std, jnp.float32).reshape(-1)

    def fold(self, scale, bias):
        inv = 1.0 / self.std
        return scale * inv, (bias - self.mean) * inv


class Scale:
    """x * factor (static scalar)."""

    def __init__(self, factor):
        self.factor = float(factor)

    def fold(self, scale, bias):
        return scale * self.factor, bias * self.factor


class Clamp:
    """clip(x, lo, hi) with static bounds."""

    def __init__(self, lo, hi):
        self.lo = float(lo)
        self.hi = float(hi)


# ------------------------ generation-aware tiling ---------------------------

def _vmem_capacity_bytes():
    try:
        return int(pltpu.get_tpu_info().vmem_capacity_bytes)
    except Exception:  # pragma: no cover - conservative fallback (v7x-sized)
        return 64 * _MIB


def _sublane_multiple(itemsize):
    # Native sublane packing: f32 -> 8, bf16/f16 -> 16, int8/u8/fp8 -> 32.
    return {4: 8, 2: 16, 1: 32}.get(int(itemsize), 8)


def _pick_tiles(R, L, itemsize, target_bytes):
    """Row/lane tile sizes: lane-dense, ~target_bytes per block, (8,128)-legal,
    never an unbounded full-extent block, >=2 grid steps when possible."""
    sub = _sublane_multiple(itemsize)

    # Lane (last-dim) tile: multiple of 128; ragged last block is masked.
    lanes_budget = max(128, ((target_bytes // (sub * itemsize)) // 128) * 128)
    if L % 128 == 0:
        tl = min(L, lanes_budget)
    elif L <= lanes_budget:
        tl = L                      # full extent, but only when it fits budget
    else:
        tl = lanes_budget           # 128-multiple tile; Pallas masks the edge

    # Row (second-to-last) tile: multiple of the native sublane pack.
    rows_budget = max(1, target_bytes // (tl * itemsize))
    if R % sub == 0:
        tr = min(R, max(sub, (rows_budget // sub) * sub))
    elif R <= rows_budget:
        tr = R                      # full extent (always legal)
    else:
        tr = max(sub, (rows_budget // sub) * sub)

    # Megacore (v7x has 2 TCs): make sure there are >= 2 grid steps on a
    # "parallel" axis whenever the problem is big enough to split.
    if pl.cdiv(R, tr) * pl.cdiv(L, tl) < 2:
        if R % sub == 0 and R >= 2 * sub:
            tr = max(sub, ((tr // 2) // sub) * sub)
        elif L % 128 == 0 and L >= 256:
            tl = max(128, ((tl // 2) // 128) * 128)
    return tr, tl


# ------------------------------- Compose -----------------------------------

class Compose:
    """Pallas port of Compose: applies transforms sequentially, with the whole
    chain fused into a single elementwise TPU kernel.  Consecutive affine
    transforms are folded into one per-channel scale/bias; clamps remain as
    separate fused stages so arbitrary orderings keep original semantics."""

    def __init__(self, transforms):
        self.transforms = list(transforms)

    def __call__(self, x):
        N, C, H, W = x.shape
        R, L = N * C, H * W
        x2 = x.reshape(R, L)  # lane-dense 2D view

        # ---- fold the transform chain into stages --------------------------
        stages = []            # ("affine", None) | ("clamp", (lo, hi))
        affine_params = []     # per-row (R, 1) scale/bias arrays
        scale = jnp.ones((C,), jnp.float32)
        bias = jnp.zeros((C,), jnp.float32)
        pending = False

        def flush():
            nonlocal scale, bias, pending
            if pending:
                affine_params.append(jnp.tile(scale, N).reshape(R, 1))
                affine_params.append(jnp.tile(bias, N).reshape(R, 1))
                stages.append(("affine", None))
                scale = jnp.ones((C,), jnp.float32)
                bias = jnp.zeros((C,), jnp.float32)
                pending = False

        for t in self.transforms:
            if isinstance(t, Clamp):
                flush()
                stages.append(("clamp", (t.lo, t.hi)))
            else:
                scale, bias = t.fold(scale, bias)
                pending = True
        flush()
        n_params = len(affine_params)

        # Integer inputs produce float output (matches torchvision Normalize).
        out_dtype = (x.dtype if jnp.issubdtype(x.dtype, jnp.floating)
                     else jnp.float32)

        # ---- fused elementwise kernel --------------------------------------
        def kernel(x_ref, *refs):
            param_refs = refs[:n_params]
            out_ref = refs[n_params]
            v = x_ref[...].astype(jnp.float32)
            pi = 0
            for kind, payload in stages:   # sequential application, fused
                if kind == "affine":
                    v = v * param_refs[pi][...] + param_refs[pi + 1][...]
                    pi += 2
                else:                      # clamp with static bounds
                    lo, hi = payload
                    v = jnp.clip(v, lo, hi)
            out_ref[...] = v.astype(out_ref.dtype)

        # ---- generation-aware tiling / specs --------------------------------
        itemsize = jnp.dtype(x.dtype).itemsize
        out_itemsize = jnp.dtype(out_dtype).itemsize
        vmem_cap = _vmem_capacity_bytes()
        # ~4 MiB blocks on v7x (64 MiB VMEM), ~8 MiB on v5e/v6e (128 MiB).
        target_bytes = 4 * _MIB if vmem_cap <= 64 * _MIB else 8 * _MIB
        tr, tl = _pick_tiles(R, L, itemsize, target_bytes)
        grid = (pl.cdiv(R, tr), pl.cdiv(L, tl))      # lane axis innermost

        x_spec = pl.BlockSpec((tr, tl), lambda i, j: (i, j))
        param_specs = [pl.BlockSpec((tr, 1), lambda i, j: (i, 0))
                       for _ in affine_params]
        out_spec = pl.BlockSpec((tr, tl), lambda i, j: (i, j))

        # VMEM budget: double-buffered in/out blocks + in-kernel f32 temps
        # + padded param streams + compiler scratch headroom.  Cap well under
        # physical VMEM (v7x: never the full 64 MiB).
        io_block = tr * tl * (itemsize + out_itemsize)
        f32_block = tr * tl * 4
        param_bytes = n_params * tr * 128 * 4        # (tr,1) padded to (tr,128)
        vmem_need = 2 * io_block + 2 * f32_block + 4 * param_bytes + 2 * _MIB
        vmem_limit = int(min(max(16 * _MIB, vmem_cap - 16 * _MIB),
                             max(8 * _MIB, vmem_need)))

        out2 = pl.pallas_call(
            kernel,
            out_shape=jax.ShapeDtypeStruct((R, L), out_dtype),
            grid=grid,
            in_specs=[x_spec] + param_specs,
            out_specs=out_spec,
            compiler_params=pltpu.CompilerParams(
                dimension_semantics=("parallel", "parallel"),
                vmem_limit_bytes=vmem_limit),
        )(x2, *affine_params)

        return out2.reshape(N, C, H, W)


# --------------------------------- main -------------------------------------

if __name__ == "__main__":
    key = jax.random.PRNGKey(0)
    N, C, H, W = 2, 4, 16, 16
    x = jax.random.normal(key, (N, C, H, W), dtype=jnp.float32)

    mean = jnp.linspace(-0.5, 0.5, C, dtype=jnp.float32)
    std = jnp.linspace(0.5, 1.5, C, dtype=jnp.float32)

    pipeline = Compose([
        Normalize(mean, std),
        Scale(2.0),
        Clamp(-1.0, 1.0),
    ])

    # pure-JAX reference of the same sequential composition
    ref = (x - mean.reshape(1, C, 1, 1)) / std.reshape(1, C, 1, 1)
    ref = jnp.clip(ref * 2.0, -1.0, 1.0)

    y = pipeline(x)
    jax.block_until_ready(y)

    assert y.shape == x.shape and y.dtype == x.dtype
    assert jnp.allclose(y, ref, atol=1e-5), "mismatch vs reference"

    print("KERNEL_OK")
</pallas_src>

<mosaic_0001>
module attributes {stable_mosaic.version = 11 : i64} {
  func.func @kernel(%arg0: i32, %arg1: i32, %arg2: memref<8x128xf32, #tpu.memory_space<vmem>>, %arg3: memref<8x1xf32, #tpu.memory_space<vmem>>, %arg4: memref<8x1xf32, #tpu.memory_space<vmem>>, %arg5: memref<8x128xf32, #tpu.memory_space<vmem>>) attributes {dimension_semantics = [#tpu.dimension_semantics<parallel>, #tpu.dimension_semantics<parallel>], iteration_bounds = array<i64: 1, 2>, scalar_prefetch = 0 : i64, scratch_operands = 0 : i64, tpu.core_type = #tpu.core_type<tc>, window_params = [{transform_indices = @transform_0, window_bounds = array<i64: 8, 128>}, {transform_indices = @transform_1, window_bounds = array<i64: 8, 1>}, {transform_indices = @transform_2, window_bounds = array<i64: 8, 1>}, {transform_indices = @transform_3, window_bounds = array<i64: 8, 128>}]} {
    %c0 = arith.constant 0 : index
    %c0_0 = arith.constant 0 : index
    %0 = vector.load %arg2[%c0, %c0_0] : memref<8x128xf32, #tpu.memory_space<vmem>>, vector<8x128xf32>
    %c0_1 = arith.constant 0 : index
    %c0_2 = arith.constant 0 : index
    %1 = vector.load %arg3[%c0_1, %c0_2] : memref<8x1xf32, #tpu.memory_space<vmem>>, vector<8x1xf32>
    %2 = vector.broadcast %1 : vector<8x1xf32> to vector<8x128xf32>
    %3 = arith.mulf %0, %2 : vector<8x128xf32>
    %c0_3 = arith.constant 0 : index
    %c0_4 = arith.constant 0 : index
    %4 = vector.load %arg4[%c0_3, %c0_4] : memref<8x1xf32, #tpu.memory_space<vmem>>, vector<8x1xf32>
    %5 = vector.broadcast %4 : vector<8x1xf32> to vector<8x128xf32>
    %6 = arith.addf %3, %5 : vector<8x128xf32>
    %cst = arith.constant -1.000000e+00 : f32
    %cst_5 = arith.constant 1.000000e+00 : f32
    %7 = vector.broadcast %cst : f32 to vector<8x128xf32>
    %8 = arith.maximumf %7, %6 : vector<8x128xf32>
    %9 = vector.broadcast %cst_5 : f32 to vector<8x128xf32>
    %10 = arith.minimumf %9, %8 : vector<8x128xf32>
    %c0_6 = arith.constant 0 : index
    %c0_7 = arith.constant 0 : index
    %11 = vector.load %arg5[%c0_6, %c0_7] : memref<8x128xf32, #tpu.memory_space<vmem>>, vector<8x128xf32>
    tpu.vector_store %arg5[%c0_6, %c0_7], %10 {strides = array<i32>} : memref<8x128xf32, #tpu.memory_space<vmem>>, vector<8x128xf32>,
    return
  }
  func.func @transform_0(%arg0: i32, %arg1: i32) -> (i32, i32) {
    %c0_i32 = arith.constant 0 : i32
    return %arg0, %arg1 : i32, i32
  }
  func.func @transform_1(%arg0: i32, %arg1: i32) -> (i32, i32) {
    %c0_i32 = arith.constant 0 : i32
    %c0_i32_0 = arith.constant 0 : i32
    return %arg0, %c0_i32 : i32, i32
  }
  func.func @transform_2(%arg0: i32, %arg1: i32) -> (i32, i32) {
    %c0_i32 = arith.constant 0 : i32
    %c0_i32_0 = arith.constant 0 : i32
    return %arg0, %c0_i32 : i32, i32
  }
  func.func @transform_3(%arg0: i32, %arg1: i32) -> (i32, i32) {
    %c0_i32 = arith.constant 0 : i32
    return %arg0, %arg1 : i32, i32
  }
}

</mosaic_0001>

<bundles_post_ra>
// kernel: tpu_custom_call.1
= control target key start
LH: loop header
LB: loop body
LE: loop exit
PB: predicated region body
PF: predicated region fallthrough
CT: control target
= control target key end

     0   :  { %8 = vsyncpa [#allocation3], 0  ;;  %s658_s0 = inlined_call_operand.vmem [shape: f32[8,256], index: 0, kind: input, shape index: {}]   ;;  %s659_s1 = inlined_call_operand.vmem [shape: f32[8,1], index: 1, kind: input, shape index: {}]   ;;  %s660_s2 = inlined_call_operand.vmem [shape: f32[8,1], index: 2, kind: input, shape index: {}]   ;;  %s661_s3 = inlined_call_operand.hbm [shape: f32[8,256], index: 3, kind: output, shape index: {}]  }
   0x1   :  { %10 = vsyncpa [#allocation3 + $0x1], 0  ;;  %s540_s12 = smov 0   ;;  %s542_s13 = smov 0  }
   0x2   :  { %s544_s14 = smov 0   ;;  %s546_s15 = smov 0  }
   0x3   :  { %s548_s16 = smov 0   ;;  %s550_s17 = smov 0  }
   0x4 LB: > { %s367_s18 = sadd.s32 4294967295, %s516_s17   ;;  %s368_s19 = sadd.s32 4294967294, %s516_s17   ;;  %s516_s17 = sphi %s550_s17, %s16_s17   ;;  %s512_s16 = sphi %s548_s16, %s668_s16   ;;  %s508_s15 = sphi %s546_s15, %s667_s15   ;;  %s504_s14 = sphi %s544_s14, %s666_s14   ;;  %s500_s13 = sphi %s542_s13, %s665_s13   ;;  %s496_s12 = sphi %s540_s12, %s664_s12  }
   0x5   : > { %s25_s20 = sadd.s32 1, %s512_s16  ;;  %s117_s21 = sadd.s32 1, %s504_s14 }
   0x6   : > { %p26_p0 = scmp.ge.s32.totalorder %s25_s20, 2  ;;  %p127_p1 = scmp.ne.s32.totalorder %s504_s14, %s500_s13 }
   0x7   : > { %p128_p2 = scmp.eq.s32.totalorder %s367_s18, 1  ;;  %p133_p3 = scmp.ne.s32.totalorder %s500_s13, %s496_s12 }
   0x8   : > { %s670_s20 = smov (%p26_p0, %s25_s20), 0  ;;  %p134_p5 = scmp.eq.s32.totalorder %s368_s19, 1 }
   0x9   : > { %p580_p4 = por %p128_p2, %p127_p1  ;;  %s113_s23 = ssub.s32 %s512_s16, %s670_s20 }
   0xa   : > { %p373_p6 = scmp.ge.s32.totalorder %s516_s17, 1  ;;  %p115_p7 = scmp.eq.s32.totalorder %s113_s23, 0 }
   0xb   : > { %p587_p8 = por %p134_p5, %p133_p3  ;;  %p177_p9 = scmp.lt.s32.totalorder %s516_s17, 3 }
   0xc   : > { %s593_s25 = scalar_select %p115_p7, %s504_s14, %s117_s21  }
   0xd   : > { %p178_p10 = pnand %p373_p6, %p177_p9 }
   0xe   : > { %v229_v0 = vld [vmem:[%s659_s1] sm:$0xff] (!%p178_p10)  ;;  %v518_v1 = vmov (!%p178_p10), 0   ;;  %p214_p11 = scmp.lt.s32.totalorder (!%p178_p10), %s508_s15, 1  ;;  %s209_s5 = sand.u32 (!%p178_p10), 1, %s500_s13  }
   0xf   : > { %181 = sbr.rel (%p178_p10) target bundleno = 166 (0xa6), region = 32  ;;  %437 = vset.pattern.permute.xlu0 (!%p178_p10), %v518_v1  ;;  %v236_v2 = vld [vmem:[%s660_s2] sm:$0xff] (!%p178_p10)  ;;  %s374_s9 = sshll.u32 (!%p178_p10), %s209_s5, 3 }
  0x10   : > { %232 = vperm.xlu0 (!%p178_p10), %437, %v229_v0   ;;  %s378_s10 = sshll.u32 (!%p178_p10), %s508_s15, 7  ;;  %s211_s11 = scalar_lea.vmem (!%p178_p10), [#allocation2], %s374_s9 }
  0x11   : > { %s262_s18 = sshll.u32 (!%p178_p10), %s211_s11, 4  ;;  %s611_s23 = scalar_lea.hbm (!%p178_p10), %s661_s3, %s378_s10  ;;  %s613_s18 = int_to_ptr.vmem [resolvable:$true] %s262_s18 }
  0x12   : > { %s247_s26 = scalar_lea.sflag (!%p178_p10), [#allocation3], %s209_s5  ;;  %s438_s27 = scalar_lea.vmem (!%p178_p10), %s613_s18, 128 }
  0x13   : > { %p439_p12 = scmp.ne.s32.totalorder (!%p178_p10), %s613_s18, %s438_s27 }
  0x14   : > { %239 = vperm.xlu0 (!%p178_p10), %437, %v236_v2  }
  0x15   : > { %p440_p13 = pnand (!%p178_p10), %p439_p12, %p580_p4 }
  0x16   : > { %s215_s30 = scalar_select %p214_p11, %s508_s15, 1 }
  0x17   : > { %p441_p0 = pneg %p440_p13  ;;  %s519_s15 = smov [#allocation2]  }
  0x18   : > { %s375_s4 = sshll.u32 %s215_s30, 3  ;;  %s442_s28 = sshll.u32 %s519_s15, 4  ;;  %s443_s28 = int_to_ptr.vmem [resolvable:$false] %s442_s28 }
  0x19   : > { %s219_s8 = scalar_lea.vmem %s658_s0, %s375_s4  ;;  %s444_s29 = scalar_lea.vmem %s443_s28, 256 }
  0x1a   : > { %v228_v4 = vld [vmem:[%s219_s8] sm:$0xff]  ;;  %p445_p1 = scmp.lt.s32.totalorder %s613_s18, %s443_s28  ;;  %p446_p2 = scmp.lt.s32.totalorder %s444_s29, %s438_s27 }
  0x1c   : > { %p447_p3 = por %p446_p2, %p445_p1 }
  0x1e   : > { %p448_p5 = pnand %p447_p3, %p441_p0 }
  0x8f   : > { %v233_v3 = vpop.permute.xlu0 %232 }
  0x90   : > { %v235_v5 = vmul.f32 %v233_v3, %v228_v4 }
  0x93   : > { %v240_v6 = vpop.permute.xlu0 %239 }
  0x94   : > { %v242_v7 = vadd.f32 %v240_v6, %v235_v5 }
  0x96   : > { %v376_v8 = vclamps-f32 %v242_v7, 1.0 }
  0x98   : > { %245 = vst [vmem:[%s211_s11] sm:$0xff] %v376_v8 }
  0x99   : > { %451 = shalt.err (!%p448_p5)
}
  0x9a   : > { %s452_s30 = scalar_lea.hbm %s611_s23, 128  ;;  %s456_s6 = scalar_lea.hbm %s661_s3, 256 }
  0x9b   : > { %p453_p6 = scmp.ne.s32.totalorder %s611_s23, %s452_s30  ;;  %p457_p10 = scmp.lt.u32.totalorder %s611_s23, %s661_s3 }
  0x9c   : > { %p458_p11 = scmp.lt.u32.totalorder %s456_s6, %s452_s30  ;;  %p460_p13 = scmp.lt.u32.totalorder %s452_s30, %s611_s23 }
  0x9d   : > { %p454_p7 = pnand %p453_p6, %p580_p4 }
  0x9e   : > { %p459_p12 = por %p458_p11, %p457_p10 }
  0x9f   : > { %p455_p9 = pneg %p454_p7 }
  0xa0   : > { %p461_p0 = por %p460_p13, %p459_p12 }
  0xa2   : > { %p462_p1 = pnand %p461_p0, %p455_p9 }
  0xa4   : > { %465 = shalt.err (!%p462_p1)
}
  0xa5   : > { %381 = dma.vmem_to_hbm [thread:$0]  (%p580_p4), %s613_s18, 128, %s611_s23, %s247_s26  }
  0xa6 PF: > { %p387_p2 = scmp.ge.s32.totalorder %s516_s17, 2  ;;  %s274_s9 = sand.u32 1, %s496_s12  }
  0xa7   : > { %s275_s10 = scalar_lea.sflag [#allocation3], %s274_s9 }
  0xa8   : > { %p384_p3 = pnand %p387_p2, %p587_p8 }
  0xaa   : > { %491 = dma.done.wait (!%p384_p3), %s275_s10, 128  }
  0xab   : > { %493 = vsyncadd (!%p384_p3), %s275_s10, 4294967168  ;;  %s16_s17 = sadd.s32 1, %s516_s17   ;;  %s664_s12 = smov %s500_s13 }
  0xac   : > { %p13_p5 = scmp.ge.s32.totalorder %s16_s17, 4   ;;  %s665_s13 = smov %s504_s14 }
  0xad   : > { %s666_s14 = smov %s593_s25  ;;  %s667_s15 = smov %s512_s16 }
  0xae   : > { %s668_s16 = smov %s670_s20  ;;  %15 = sbr.rel (!%p13_p5) target bundleno = 4 (0x4), region = 73 }
  0xb5   :  { %280 = vsyncpa [#allocation3], 1 }
  0xb6   :  { %282 = vsyncpa [#allocation3 + $0x1], 1 }

</bundles_post_ra>
